<compile_context>
chip_gen: v7x
topology: tpu7x:2x2x1
jax: 0.10.0
libtpu: 0.0.40
codegen_flags: <defaults>
</compile_context>

<pallas_src>
import functools

import jax
import jax.numpy as jnp
from jax.experimental import pallas as pl
from jax.experimental.pallas import tpu as pltpu


def _round_up(x, m):
    return (x + m - 1) // m * m


def latent_kernel(x_ref, w_ref, b_ref, eps_ref, out_ref, *, o_pad):
    x = x_ref[...]
    # Single fused GEMM for both heads: [TB, I] @ [I, 2*O_pad] + bias (f32 acc).
    y = jnp.dot(x, w_ref[...], preferred_element_type=jnp.float32) + b_ref[...]
    mu = y[:, :o_pad]                       # lane-aligned slice (multiple of 128)
    lv = y[:, o_pad:]                       # +1e-4 already folded into the bias
    z = mu + jnp.exp(lv) * eps_ref[...]     # exp -> EUP slot (free under MXU)
    # One lane-dense, 128-aligned output slab: [ z | mu | log_var ].
    out_ref[:, 0:o_pad] = z
    out_ref[:, o_pad:2 * o_pad] = mu
    out_ref[:, 2 * o_pad:3 * o_pad] = lv


def prepare_latent_params(w_mu, b_mu, w_lv, b_lv):
    """One-time parameter prep (init-time, not per call):
    transpose [O, I] -> [I, O], pad O up to a multiple of 128, concatenate the
    mu / log_var heads along the output axis, and fold the +1e-4 into b_lv."""
    o, _ = w_mu.shape
    o_pad = _round_up(o, 128)
    pad_w = lambda w: jnp.pad(w.T, ((0, 0), (0, o_pad - o)))        # [I, O_pad]
    pad_b = lambda b: jnp.pad(b, (0, o_pad - o))                    # [O_pad]
    w_cat = jnp.concatenate([pad_w(w_mu), pad_w(w_lv)], axis=1)     # [I, 2*O_pad]
    b_cat = jnp.concatenate([pad_b(b_mu), pad_b(b_lv + 1e-4)])[None, :]
    return w_cat, b_cat, o, o_pad


def latent_forward(x, w_cat, b_cat, eps, o, o_pad):
    """x: [B, I] f32, eps: [B, O] f32 -> (z, mu, log_var), each [B, O] f32."""
    b, i = x.shape
    # Batch tile: big enough to amortize per-step overhead, 8-sublane aligned.
    tb = 256 if b >= 256 else _round_up(b, 8)
    b_pad = _round_up(b, tb)
    if b_pad != b:
        x = jnp.pad(x, ((0, b_pad - b), (0, 0)))
    # Pad eps to the lane-aligned width (padded lanes multiply zero weights).
    eps_p = jnp.pad(eps, ((0, b_pad - b), (0, o_pad - o)))

    out = pl.pallas_call(
        functools.partial(latent_kernel, o_pad=o_pad),
        out_shape=jax.ShapeDtypeStruct((b_pad, 3 * o_pad), jnp.float32),
        grid_spec=pltpu.PrefetchScalarGridSpec(
            num_scalar_prefetch=0,
            grid=(b_pad // tb,),
            in_specs=[
                pl.BlockSpec((tb, i), lambda n: (n, 0)),           # x tile
                pl.BlockSpec((i, 2 * o_pad), lambda n: (0, 0)),    # fused W (resident)
                pl.BlockSpec((1, 2 * o_pad), lambda n: (0, 0)),    # fused bias
                pl.BlockSpec((tb, o_pad), lambda n: (n, 0)),       # eps tile
            ],
            out_specs=pl.BlockSpec((tb, 3 * o_pad), lambda n: (n, 0)),
        ),
        compiler_params=pltpu.CompilerParams(
            dimension_semantics=("parallel",)),
    )(x, w_cat, b_cat, eps_p)

    z = out[:b, 0:o]
    mu = out[:b, o_pad:o_pad + o]
    log_var = out[:b, 2 * o_pad:2 * o_pad + o]
    return z, mu, log_var


if __name__ == "__main__":
    B, I, O = 8, 32, 16  # small shapes; Latent(i=32, o=16)

    key = jax.random.PRNGKey(0)
    kx, kwm, kbm, kwl, kbl, keps = jax.random.split(key, 6)

    # Deterministic synthetic parameters (PyTorch Linear shapes: W [O, I], b [O]).
    bound = 1.0 / jnp.sqrt(jnp.float32(I))
    x = jax.random.normal(kx, (B, I), dtype=jnp.float32)
    w_mu = jax.random.uniform(kwm, (O, I), jnp.float32, -bound, bound)
    b_mu = jax.random.uniform(kbm, (O,), jnp.float32, -bound, bound)
    w_lv = jax.random.uniform(kwl, (O, I), jnp.float32, -bound, bound)
    b_lv = jax.random.uniform(kbl, (O,), jnp.float32, -bound, bound)
    eps = jax.random.normal(keps, (B, O), dtype=jnp.float32)

    # One-time parameter prep (fuse + transpose + pad + fold the 1e-4 constant).
    w_cat, b_cat, o, o_pad = prepare_latent_params(w_mu, b_mu, w_lv, b_lv)

    z, mu, log_var = latent_forward(x, w_cat, b_cat, eps, o, o_pad)
    jax.block_until_ready((z, mu, log_var))

    # Pure-JAX reference of the PyTorch forward semantics.
    mu_ref = x @ w_mu.T + b_mu
    lv_ref = x @ w_lv.T + b_lv + 0.0001
    z_ref = mu_ref + jnp.exp(lv_ref) * eps
    assert jnp.allclose(mu, mu_ref, atol=1e-5, rtol=1e-5)
    assert jnp.allclose(log_var, lv_ref, atol=1e-5, rtol=1e-5)
    assert jnp.allclose(z, z_ref, atol=1e-5, rtol=1e-5)

    print("KERNEL_OK")
</pallas_src>

<mosaic_0001>
module attributes {stable_mosaic.version = 11 : i64} {
  func.func @latent_kernel(%arg0: i32, %arg1: memref<8x32xf32, #tpu.memory_space<vmem>>, %arg2: memref<32x256xf32, #tpu.memory_space<vmem>>, %arg3: memref<1x256xf32, #tpu.memory_space<vmem>>, %arg4: memref<8x128xf32, #tpu.memory_space<vmem>>, %arg5: memref<8x384xf32, #tpu.memory_space<vmem>>) attributes {dimension_semantics = [#tpu.dimension_semantics<parallel>], iteration_bounds = array<i64: 1>, scalar_prefetch = 0 : i64, scratch_operands = 0 : i64, tpu.core_type = #tpu.core_type<tc>, window_params = [{transform_indices = @transform_0, window_bounds = array<i64: 8, 32>}, {pipeline_mode = #tpu.pipeline_mode<synchronous>, transform_indices = @transform_1, window_bounds = array<i64: 32, 256>}, {pipeline_mode = #tpu.pipeline_mode<synchronous>, transform_indices = @transform_2, window_bounds = array<i64: 1, 256>}, {transform_indices = @transform_3, window_bounds = array<i64: 8, 128>}, {transform_indices = @transform_4, window_bounds = array<i64: 8, 384>}]} {
    %c0 = arith.constant 0 : index
    %c0_0 = arith.constant 0 : index
    %0 = vector.load %arg1[%c0, %c0_0] : memref<8x32xf32, #tpu.memory_space<vmem>>, vector<8x32xf32>
    %c0_1 = arith.constant 0 : index
    %c0_2 = arith.constant 0 : index
    %1 = vector.load %arg2[%c0_1, %c0_2] : memref<32x256xf32, #tpu.memory_space<vmem>>, vector<32x256xf32>
    %cst = arith.constant dense<0.000000e+00> : vector<8x256xf32>
    %2 = tpu.matmul %0, %1, %cst {dimension_numbers = #tpu.dot_dimension_numbers<[1], [0], [0], [1], [0, 0, 1, 1], [], []>} : vector<8x32xf32>, vector<32x256xf32>, vector<8x256xf32> -> vector<8x256xf32>
    %c0_3 = arith.constant 0 : index
    %c0_4 = arith.constant 0 : index
    %3 = vector.load %arg3[%c0_3, %c0_4] : memref<1x256xf32, #tpu.memory_space<vmem>>, vector<1x256xf32>
    %4 = vector.broadcast %3 : vector<1x256xf32> to vector<8x256xf32>
    %5 = arith.addf %2, %4 : vector<8x256xf32>
    %6 = vector.extract_strided_slice %5 {offsets = [0, 0], sizes = [8, 128], strides = [1, 1]} : vector<8x256xf32> to vector<8x128xf32>
    %7 = vector.extract_strided_slice %5 {offsets = [0, 128], sizes = [8, 128], strides = [1, 1]} : vector<8x256xf32> to vector<8x128xf32>
    %8 = math.exp %7 : vector<8x128xf32>
    %c0_5 = arith.constant 0 : index
    %c0_6 = arith.constant 0 : index
    %9 = vector.load %arg4[%c0_5, %c0_6] : memref<8x128xf32, #tpu.memory_space<vmem>>, vector<8x128xf32>
    %10 = arith.mulf %8, %9 : vector<8x128xf32>
    %11 = arith.addf %6, %10 : vector<8x128xf32>
    %c0_7 = arith.constant 0 : index
    %c0_8 = arith.constant 0 : index
    %12 = vector.load %arg5[%c0_7, %c0_8] : memref<8x384xf32, #tpu.memory_space<vmem>>, vector<8x128xf32>
    tpu.vector_store %arg5[%c0_7, %c0_8], %11 {strides = array<i32>} : memref<8x384xf32, #tpu.memory_space<vmem>>, vector<8x128xf32>,
    %c0_9 = arith.constant 0 : index
    %c128 = arith.constant 128 : index
    %13 = vector.load %arg5[%c0_9, %c128] : memref<8x384xf32, #tpu.memory_space<vmem>>, vector<8x128xf32>
    tpu.vector_store %arg5[%c0_9, %c128], %6 {strides = array<i32>} : memref<8x384xf32, #tpu.memory_space<vmem>>, vector<8x128xf32>,
    %c0_10 = arith.constant 0 : index
    %c256 = arith.constant 256 : index
    %14 = vector.load %arg5[%c0_10, %c256] : memref<8x384xf32, #tpu.memory_space<vmem>>, vector<8x128xf32>
    tpu.vector_store %arg5[%c0_10, %c256], %7 {strides = array<i32>} : memref<8x384xf32, #tpu.memory_space<vmem>>, vector<8x128xf32>,
    return
  }
  func.func @transform_0(%arg0: i32) -> (i32, i32) {
    %c0_i32 = arith.constant 0 : i32
    %c0_i32_0 = arith.constant 0 : i32
    return %arg0, %c0_i32 : i32, i32
  }
  func.func @transform_1(%arg0: i32) -> (i32, i32) {
    %c0_i32 = arith.constant 0 : i32
    %c0_i32_0 = arith.constant 0 : i32
    %c0_i32_1 = arith.constant 0 : i32
    return %c0_i32, %c0_i32_0 : i32, i32
  }
  func.func @transform_2(%arg0: i32) -> (i32, i32) {
    %c0_i32 = arith.constant 0 : i32
    %c0_i32_0 = arith.constant 0 : i32
    %c0_i32_1 = arith.constant 0 : i32
    return %c0_i32, %c0_i32_0 : i32, i32
  }
  func.func @transform_3(%arg0: i32) -> (i32, i32) {
    %c0_i32 = arith.constant 0 : i32
    %c0_i32_0 = arith.constant 0 : i32
    return %arg0, %c0_i32 : i32, i32
  }
  func.func @transform_4(%arg0: i32) -> (i32, i32) {
    %c0_i32 = arith.constant 0 : i32
    %c0_i32_0 = arith.constant 0 : i32
    return %arg0, %c0_i32 : i32, i32
  }
}

</mosaic_0001>

<bundles_post_ra>
// kernel: tpu_custom_call.1
= control target key start
LH: loop header
LB: loop body
LE: loop exit
PB: predicated region body
PF: predicated region fallthrough
CT: control target
= control target key end

     0   :  { %9 = vsyncpa [#allocation3], 0  ;;  %s333_s0 = inlined_call_operand.hbm [shape: f32[8,32], index: 0, kind: input, shape index: {}]   ;;  %s334_s1 = inlined_call_operand.hbm [shape: f32[32,256], index: 1, kind: input, shape index: {}]   ;;  %s335_s2 = inlined_call_operand.vmem [shape: f32[1,256], index: 2, kind: input, shape index: {}]   ;;  %s336_s3 = inlined_call_operand.vmem [shape: f32[8,128], index: 3, kind: input, shape index: {}]   ;;  %s337_s4 = inlined_call_operand.hbm [shape: f32[8,384], index: 4, kind: output, shape index: {}]  }
   0x1   :  { %10 = vsyncpa [#allocation6], 0 }
   0x2   :  { %11 = vsyncpa [#allocation4], 0  ;;  %s253_s15 = smov [#allocation2]   ;;  %s254_s17 = smov [#allocation5]  }
   0x3   :  { %s18_s16 = sshll.u32 %s253_s15, 4  ;;  %s27_s18 = sshll.u32 %s254_s17, 4  ;;  %s19_s16 = int_to_ptr.vmem [resolvable:$true] %s18_s16  ;;  %s284_s18 = int_to_ptr.vmem [resolvable:$true] %s27_s18 }
   0x4   :  { %s181_s21 = scalar_lea.hbm %s333_s0, 128 }
   0x5   :  { %p182_p0 = scmp.ne.s32.totalorder %s333_s0, %s181_s21  ;;  %p185_p1 = scmp.lt.u32.totalorder %s181_s21, %s333_s0 }
   0x7   :  { %p187_p2 = pnand %p185_p1, %p182_p0 }
   0x9   :  { %190 = shalt.err (!%p187_p2)
}
   0xa   :  { %s191_s26 = scalar_lea.vmem %s19_s16, 128  ;;  %p196_p4 = scmp.lt.s32.totalorder %s19_s16, %s19_s16 }
   0xb   :  { %p192_p3 = scmp.ne.s32.totalorder %s19_s16, %s191_s26  ;;  %p197_p5 = scmp.lt.s32.totalorder %s191_s26, %s191_s26 }
   0xd   :  { %p198_p6 = por %p197_p5, %p196_p4 }
   0xf   :  { %p199_p7 = pnand %p198_p6, %p192_p3 }
  0x11   :  { %202 = shalt.err (!%p199_p7)
}
  0x12   :  { %21 = dma.hbm_to_vmem [thread:$0]  %s333_s0, 128, %s19_s16, [#allocation3]  }
  0x13   :  { %s203_s5 = scalar_lea.hbm %s334_s1, 1024 }
  0x14   :  { %p204_p8 = scmp.ne.s32.totalorder %s334_s1, %s203_s5  ;;  %p207_p9 = scmp.lt.u32.totalorder %s203_s5, %s334_s1 }
  0x16   :  { %p209_p10 = pnand %p207_p9, %p204_p8 }
  0x18   :  { %212 = shalt.err (!%p209_p10)
}
  0x19   :  { %s213_s10 = scalar_lea.vmem %s284_s18, 1024  ;;  %p218_p12 = scmp.lt.s32.totalorder %s284_s18, %s284_s18 }
  0x1a   :  { %p214_p11 = scmp.ne.s32.totalorder %s284_s18, %s213_s10  ;;  %p219_p13 = scmp.lt.s32.totalorder %s213_s10, %s213_s10 }
  0x1c   :  { %p220_p0 = por %p219_p13, %p218_p12 }
  0x1e   :  { %p221_p1 = pnand %p220_p0, %p214_p11 }
  0x20   :  { %224 = shalt.err (!%p221_p1)
}
  0x21   :  { %s255_s0 = smov 256   ;;  %s256_s11 = smov 16  }
  0x22   :  { %33 = dma.hbm_to_vmem [thread:$0]  %s334_s1, 1024, %s284_s18, [#allocation6], %s255_s0, %s255_s0, %s256_s11  }
  0x23   :  { %247 = dma.done.wait [#allocation3], 128  }
  0x24   :  { %248 = vsyncadd [#allocation3], 4294967168 }
  0x25   :  { %249 = dma.done.wait [#allocation6], 1024  }
  0x26   :  { %250 = vsyncadd [#allocation6], 4294966272  ;;  %v257_v0 = vmov 0.0   ;;  %v46_v1 = vld [vmem:[#allocation5 + $0x8] sm:$0xff]  ;;  %v48_v2 = vld [vmem:[#allocation5 + $0x18] sm:$0xff]  ;;  %vm65_vm0 = vcmask 261120   ;;  %v55_v14 = vlaneseq }
  0x27   :  { %133 = vmatprep.mubr.f32.mxu0 %v257_v0  ;;  %v45_v3 = vld [vmem:[#allocation5] sm:$0xff]  ;;  %v165_v4 = vpack.c.bf16 %v48_v2, %v46_v1  ;;  %v47_v5 = vld [vmem:[#allocation5 + $0x10] sm:$0xff]  ;;  %v50_v6 = vld [vmem:[#allocation5 + $0x28] sm:$0xff]  ;;  %s258_s17 = smov [#allocation7]  }
  0x28   :  { %v52_v7 = vld [vmem:[#allocation5 + $0x38] sm:$0xff]  ;;  %v167_v8 = vpack.c.bf16 %v47_v5, %v45_v3  ;;  %v49_v10 = vld [vmem:[#allocation5 + $0x20] sm:$0xff]  ;;  %v51_v11 = vld [vmem:[#allocation5 + $0x30] sm:$0xff]  ;;  %v56_v15 = vshrl.u32 %v55_v14, 7  ;;  %s154_s18 = sshll.u32 %s258_s17, 4  ;;  %s155_s18 = int_to_ptr.vmem [resolvable:$true] %s154_s18 }
  0x29   :  { %v169_v9 = vpack.c.bf16 %v52_v7, %v50_v6  ;;  %166 = vmatprep.subr.bf16.mxu0 %v165_v4  ;;  %v171_v12 = vpack.c.bf16 %v51_v11, %v49_v10  ;;  %v44_v13 = vld [vmem:[#allocation2] sm:$0xff]  ;;  %p230_p3 = scmp.lt.s32.totalorder %s155_s18, %s155_s18 }
  0x2a   :  { %168 = vmatpush1.bf16.msra.mxu0 %v167_v8  ;;  %v57_v16 = vsub.s32 0, %v56_v15  ;;  %v53_v17 = vld [vmem:[%s335_s2] sm:$0x3]  ;;  %v61_v18 = vsub.s32 1, %v56_v15  ;;  %s225_s2 = scalar_lea.vmem %s155_s18, 384 }
  0x2b   :  { %170 = vmatprep.subr.bf16.mxu0 %v169_v9  ;;  %v142_v26 = vld [vmem:[%s336_s3] sm:$0xff]  ;;  %p226_p2 = scmp.ne.s32.totalorder %s155_s18, %s225_s2  ;;  %p231_p4 = scmp.lt.s32.totalorder %s225_s2, %s225_s2 }
  0x2c   :  { %v58_v19 = vrot.slane %v53_v17, %v57_v16  ;;  %v62_v20 = vrot.slane %v53_v17, %v61_v18 }
  0x2d   :  { %p232_p5 = por %p231_p4, %p230_p3 }
  0x2e   :  { %172 = vmatpush1.bf16.msra.mxu0 %v171_v12 }
  0x2f   :  { %p233_p6 = pnand %p232_p5, %p226_p2 }
  0x31   :  { %164 = vmatmul.mubr.msk.f32.vlgmr.msra.gmra.mrb[0].mxu0 %vm65_vm0, %v44_v13 }
 0x104   :  { %v135_v21 = vpop.f32.mrb[0].mxu0 }
 0x105   :  { %v136_v22 = vadd.f32 %v135_v21, %v58_v19  ;;  %v137_v23 = vpop.f32.mrb[1].mxu0 }
 0x106   :  { %v138_v24 = vadd.f32 %v137_v23, %v62_v20 }
 0x107   :  { %146 = vst [vmem:[#allocation7 + $0x8] sm:$0xff] %v136_v22 }
 0x108   :  { %v140_v25 = vmul.f32 1.442695, %v138_v24  ;;  %147 = vst [vmem:[#allocation7 + $0x10] sm:$0xff] %v138_v24 }
 0x10a   :  { %179 = vpow2.f32 %v140_v25 }
 0x114   :  { %v180_v27 = vpop.eup %179 }
 0x115   :  { %v143_v28 = vmul.f32 %v180_v27, %v142_v26 }
 0x117   :  { %v144_v29 = vadd.f32 %v143_v28, %v136_v22 }
 0x119   :  { %145 = vst [vmem:[#allocation7] sm:$0xff] %v144_v29 }
 0x11a   :  { %236 = shalt.err (!%p233_p6)
}
 0x11b   :  { %s237_s21 = scalar_lea.hbm %s337_s4, 384 }
 0x11c   :  { %p238_p7 = scmp.ne.s32.totalorder %s337_s4, %s237_s21  ;;  %p241_p8 = scmp.lt.u32.totalorder %s237_s21, %s337_s4 }
 0x11e   :  { %p243_p9 = pnand %p241_p8, %p238_p7 }
 0x120   :  { %246 = shalt.err (!%p243_p9)
}
 0x121   :  { %157 = dma.vmem_to_hbm [thread:$0]  %s155_s18, 384, %s337_s4, [#allocation4]  }
 0x122   :  { %251 = dma.done.wait [#allocation4], 384  }
 0x123   :  { %252 = vsyncadd [#allocation4], 4294966912 }
 0x124   :  { %161 = vsyncpa [#allocation3], 1 }
 0x125   :  { %162 = vsyncpa [#allocation6], 1 }
 0x126   :  { %163 = vsyncpa [#allocation4], 1 }

</bundles_post_ra>
